<compile_context>
chip_gen: v5e
topology: v5e:2x2
jax: 0.10.0
libtpu: 0.0.40
codegen_flags: <defaults>
</compile_context>

<pallas_src>
import jax
import jax.numpy as jnp
from jax.experimental import pallas as pl
from jax.experimental.pallas import tpu as pltpu


def _decoder_rnn2_kernel(x_ref, h0_ref, wih_ref, whh_ref, bx_ref, bhn_ref,
                         wfc_ref, bfc_ref, z_ref, out_ref, hN_ref):
    """Fused DecoderRNN2 forward: input projection + GRU recurrence + FC head.

    x_ref   : (T*B, H)  time-flattened input sequence
    h0_ref  : (B, H)    initial hidden
    wih_ref : (H, 3H)   W_ih^T
    whh_ref : (H, 3H)   W_hh^T
    bx_ref  : (1, 3H)   b_ih with b_hh pre-added for the r/z gate columns
    bhn_ref : (1, H)    b_hh_n (hidden bias of the n gate; applied inside r*(...))
    wfc_ref : (H, F)    W_fc^T
    bfc_ref : (1, F)    b_fc
    z_ref   : (T*B, F)  FC-head outputs
    out_ref : (T*B, H)  GRU outputs
    hN_ref  : (B, H)    final hidden
    """
    TB, H = x_ref.shape
    B = h0_ref.shape[0]
    T = TB // B

    # Loop-invariant loads hoisted out of the unrolled recurrence.
    wih = wih_ref[...]                               # (H, 3H)
    whh = whh_ref[...]                               # (H, 3H)
    bhn = bhn_ref[...]                               # (1, H)

    # --- Fused input projection: one (T*B, H) x (H, 3H) matmul for all steps. ---
    gx_all = jnp.dot(x_ref[...], wih,
                     preferred_element_type=jnp.float32) + bx_ref[...]   # (T*B, 3H)

    h = h0_ref[...]                                  # (B, H)
    # T is small and static: fully unrolled serial loop (no per-step grid/DMA cost).
    # TODO(synk): switch to lax.fori_loop (carry h, dynamic store) if T grows past ~32.
    for t in range(T):
        gx = gx_all[t * B:(t + 1) * B, :]            # (B, 3H) static slice
        gh = jnp.dot(h, whh,
                     preferred_element_type=jnp.float32)   # (B, 3H)

        # PyTorch gate order [r, z, n]; r/z biases already folded into gx.
        r = jax.nn.sigmoid(gx[:, 0:H] + gh[:, 0:H])
        z = jax.nn.sigmoid(gx[:, H:2 * H] + gh[:, H:2 * H])
        n = jnp.tanh(gx[:, 2 * H:3 * H] + r * (gh[:, 2 * H:3 * H] + bhn))
        h = n + z * (h - n)                          # == (1-z)*n + z*h

        out_ref[t * B:(t + 1) * B, :] = h

    hN_ref[...] = h                                  # written once, after the loop

    # --- Fused FC head: one (T*B, H) x (H, F) matmul on the full output. ---
    out_all = out_ref[...]                           # read back the just-written outputs
    z_ref[...] = (jnp.dot(out_all, wfc_ref[...],
                          preferred_element_type=jnp.float32) + bfc_ref[...])


@jax.jit
def decoder_rnn2_forward(x, h0, w_ih, w_hh, b_ih, b_hh, w_fc, b_fc):
    """Pallas implementation of DecoderRNN2.forward.

    x    : (T, B, H) float32
    h0   : (num_layers*num_dirs, B, H) -> viewed as (1, B, H)
    w_ih : (3H, H), w_hh: (3H, H), b_ih/b_hh: (3H,)
    w_fc : (F, H),  b_fc: (F,)
    Returns (z_i (T,B,F), output (T,B,H), hidden (1,B,H)).
    """
    T, B, H = x.shape
    F = w_fc.shape[0]

    x2 = x.astype(jnp.float32).reshape(T * B, H)          # time-flattened (free reshape)
    h0_2 = h0.reshape(-1, H).astype(jnp.float32)          # hidden.view(1, -1, H) -> (B, H)

    wih_t = jnp.transpose(w_ih).astype(jnp.float32)       # (H, 3H)
    whh_t = jnp.transpose(w_hh).astype(jnp.float32)       # (H, 3H)
    wfc_t = jnp.transpose(w_fc).astype(jnp.float32)       # (H, F)

    b_ih = b_ih.astype(jnp.float32)
    b_hh = b_hh.astype(jnp.float32)
    # Fuse b_hh into the input-path bias for the r/z gates; keep b_hh_n separate
    # (it is applied inside r * (W_hn h + b_hn)).
    b_x = jnp.concatenate([b_ih[:2 * H] + b_hh[:2 * H],
                           b_ih[2 * H:]]).reshape(1, 3 * H)          # (1, 3H)
    b_hn = b_hh[2 * H:].reshape(1, H)                                # (1, H)
    b_fc2 = b_fc.astype(jnp.float32).reshape(1, F)                   # (1, F)

    # --- Single fused Pallas kernel: projection + recurrence + FC head. ---
    z2, out2, h_final = pl.pallas_call(
        _decoder_rnn2_kernel,
        out_shape=(
            jax.ShapeDtypeStruct((T * B, F), jnp.float32),
            jax.ShapeDtypeStruct((T * B, H), jnp.float32),
            jax.ShapeDtypeStruct((B, H), jnp.float32),
        ),
        grid=(1,),
        in_specs=[
            pl.BlockSpec((T * B, H), lambda i: (0, 0)),      # x (flattened)
            pl.BlockSpec((B, H), lambda i: (0, 0)),          # h0
            pl.BlockSpec((H, 3 * H), lambda i: (0, 0)),      # W_ih^T
            pl.BlockSpec((H, 3 * H), lambda i: (0, 0)),      # W_hh^T
            pl.BlockSpec((1, 3 * H), lambda i: (0, 0)),      # fused r/z/n input bias
            pl.BlockSpec((1, H), lambda i: (0, 0)),          # b_hh_n
            pl.BlockSpec((H, F), lambda i: (0, 0)),          # W_fc^T
            pl.BlockSpec((1, F), lambda i: (0, 0)),          # b_fc
        ],
        out_specs=(
            pl.BlockSpec((T * B, F), lambda i: (0, 0)),      # z_i (flattened)
            pl.BlockSpec((T * B, H), lambda i: (0, 0)),      # output (flattened)
            pl.BlockSpec((B, H), lambda i: (0, 0)),          # final hidden
        ),
        compiler_params=pltpu.CompilerParams(
            dimension_semantics=("arbitrary",),
        ),
    )(x2, h0_2, wih_t, whh_t, b_x, b_hn, wfc_t, b_fc2)

    z_i = z2.reshape(T, B, F)
    output = out2.reshape(T, B, H)
    hidden = h_final.reshape(1, B, H)
    return z_i, output, hidden


def _reference_forward(x, h0, w_ih, w_hh, b_ih, b_hh, w_fc, b_fc):
    """Pure-JAX reference (PyTorch nn.GRU semantics, gate order [r, z, n])."""
    T, B, H = x.shape
    h = h0.reshape(1, -1, H)[0]

    def step(h, xt):
        gx = xt @ w_ih.T + b_ih
        gh = h @ w_hh.T + b_hh
        r = jax.nn.sigmoid(gx[:, 0:H] + gh[:, 0:H])
        z = jax.nn.sigmoid(gx[:, H:2 * H] + gh[:, H:2 * H])
        n = jnp.tanh(gx[:, 2 * H:] + r * gh[:, 2 * H:])
        h_new = (1.0 - z) * n + z * h
        return h_new, h_new

    h_last, outs = jax.lax.scan(step, h, x)
    z_i = outs @ w_fc.T + b_fc
    return z_i, outs, h_last[None]


if __name__ == "__main__":
    # Small shapes consistent with the module: hidden_size=32, batch=2, seq=8,
    # Nleaves=2 -> FC_layers[0] = Linear(hidden, 2**(Nleaves-1) - 1 = 1).
    H, B, T = 32, 2, 8
    Nleaves = 2
    F = 2 ** (Nleaves - 1) - 1          # = 1

    key = jax.random.PRNGKey(0)
    ks = jax.random.split(key, 8)
    bound = 1.0 / jnp.sqrt(jnp.float32(H))   # PyTorch default U(-1/sqrt(H), 1/sqrt(H))

    w_ih = jax.random.uniform(ks[0], (3 * H, H), jnp.float32, -bound, bound)
    w_hh = jax.random.uniform(ks[1], (3 * H, H), jnp.float32, -bound, bound)
    b_ih = jax.random.uniform(ks[2], (3 * H,), jnp.float32, -bound, bound)
    b_hh = jax.random.uniform(ks[3], (3 * H,), jnp.float32, -bound, bound)
    w_fc = jax.random.uniform(ks[4], (F, H), jnp.float32, -bound, bound)
    b_fc = jax.random.uniform(ks[5], (F,), jnp.float32, -bound, bound)

    x = jax.random.normal(ks[6], (T, B, H), jnp.float32)
    h0 = jnp.ones((1, B, H), jnp.float32)        # initHidden()

    z_i, output, hidden = decoder_rnn2_forward(x, h0, w_ih, w_hh, b_ih, b_hh, w_fc, b_fc)
    jax.block_until_ready((z_i, output, hidden))

    z_ref, out_ref, h_ref = _reference_forward(x, h0, w_ih, w_hh, b_ih, b_hh, w_fc, b_fc)

    assert z_i.shape == (T, B, F) and output.shape == (T, B, H) and hidden.shape == (1, B, H)
    assert jnp.allclose(z_i, z_ref, atol=1e-5, rtol=1e-5)
    assert jnp.allclose(output, out_ref, atol=1e-5, rtol=1e-5)
    assert jnp.allclose(hidden, h_ref, atol=1e-5, rtol=1e-5)

    print("KERNEL_OK")
</pallas_src>

<mosaic_0001>
module attributes {stable_mosaic.version = 11 : i64} {
  func.func @_decoder_rnn2_kernel(%arg0: i32, %arg1: memref<16x32xf32, #tpu.memory_space<vmem>>, %arg2: memref<2x32xf32, #tpu.memory_space<vmem>>, %arg3: memref<32x96xf32, #tpu.memory_space<vmem>>, %arg4: memref<32x96xf32, #tpu.memory_space<vmem>>, %arg5: memref<1x96xf32, #tpu.memory_space<vmem>>, %arg6: memref<1x32xf32, #tpu.memory_space<vmem>>, %arg7: memref<32x1xf32, #tpu.memory_space<vmem>>, %arg8: memref<1x1xf32, #tpu.memory_space<vmem>>, %arg9: memref<16x1xf32, #tpu.memory_space<vmem>>, %arg10: memref<16x32xf32, #tpu.memory_space<vmem>>, %arg11: memref<2x32xf32, #tpu.memory_space<vmem>>) attributes {dimension_semantics = [#tpu.dimension_semantics<arbitrary>], iteration_bounds = array<i64: 1>, scalar_prefetch = 0 : i64, scratch_operands = 0 : i64, tpu.core_type = #tpu.core_type<tc>, window_params = [{pipeline_mode = #tpu.pipeline_mode<synchronous>, transform_indices = @transform_0, window_bounds = array<i64: 16, 32>}, {pipeline_mode = #tpu.pipeline_mode<synchronous>, transform_indices = @transform_1, window_bounds = array<i64: 2, 32>}, {pipeline_mode = #tpu.pipeline_mode<synchronous>, transform_indices = @transform_2, window_bounds = array<i64: 32, 96>}, {pipeline_mode = #tpu.pipeline_mode<synchronous>, transform_indices = @transform_3, window_bounds = array<i64: 32, 96>}, {pipeline_mode = #tpu.pipeline_mode<synchronous>, transform_indices = @transform_4, window_bounds = array<i64: 1, 96>}, {pipeline_mode = #tpu.pipeline_mode<synchronous>, transform_indices = @transform_5, window_bounds = array<i64: 1, 32>}, {pipeline_mode = #tpu.pipeline_mode<synchronous>, transform_indices = @transform_6, window_bounds = array<i64: 32, 1>}, {pipeline_mode = #tpu.pipeline_mode<synchronous>, transform_indices = @transform_7, window_bounds = array<i64: 1, 1>}, {pipeline_mode = #tpu.pipeline_mode<synchronous>, transform_indices = @transform_8, window_bounds = array<i64: 16, 1>}, {pipeline_mode = #tpu.pipeline_mode<synchronous>, transform_indices = @transform_9, window_bounds = array<i64: 16, 32>}, {pipeline_mode = #tpu.pipeline_mode<synchronous>, transform_indices = @transform_10, window_bounds = array<i64: 2, 32>}]} {
    %c0 = arith.constant 0 : index
    %c0_0 = arith.constant 0 : index
    %0 = vector.load %arg3[%c0, %c0_0] : memref<32x96xf32, #tpu.memory_space<vmem>>, vector<32x96xf32>
    %c0_1 = arith.constant 0 : index
    %c0_2 = arith.constant 0 : index
    %1 = vector.load %arg4[%c0_1, %c0_2] : memref<32x96xf32, #tpu.memory_space<vmem>>, vector<32x96xf32>
    %c0_3 = arith.constant 0 : index
    %c0_4 = arith.constant 0 : index
    %2 = vector.load %arg6[%c0_3, %c0_4] : memref<1x32xf32, #tpu.memory_space<vmem>>, vector<1x32xf32>
    %c0_5 = arith.constant 0 : index
    %c0_6 = arith.constant 0 : index
    %3 = vector.load %arg1[%c0_5, %c0_6] : memref<16x32xf32, #tpu.memory_space<vmem>>, vector<16x32xf32>
    %cst = arith.constant dense<0.000000e+00> : vector<16x96xf32>
    %4 = tpu.matmul %3, %0, %cst {dimension_numbers = #tpu.dot_dimension_numbers<[1], [0], [0], [1], [0, 0, 1, 1], [], []>} : vector<16x32xf32>, vector<32x96xf32>, vector<16x96xf32> -> vector<16x96xf32>
    %c0_7 = arith.constant 0 : index
    %c0_8 = arith.constant 0 : index
    %5 = vector.load %arg5[%c0_7, %c0_8] : memref<1x96xf32, #tpu.memory_space<vmem>>, vector<1x96xf32>
    %6 = vector.broadcast %5 : vector<1x96xf32> to vector<16x96xf32>
    %7 = arith.addf %4, %6 : vector<16x96xf32>
    %c0_9 = arith.constant 0 : index
    %c0_10 = arith.constant 0 : index
    %8 = vector.load %arg2[%c0_9, %c0_10] : memref<2x32xf32, #tpu.memory_space<vmem>>, vector<2x32xf32>
    %9 = vector.extract_strided_slice %7 {offsets = [0, 0], sizes = [2, 96], strides = [1, 1]} : vector<16x96xf32> to vector<2x96xf32>
    %cst_11 = arith.constant dense<0.000000e+00> : vector<2x96xf32>
    %10 = tpu.matmul %8, %1, %cst_11 {dimension_numbers = #tpu.dot_dimension_numbers<[1], [0], [0], [1], [0, 0, 1, 1], [], []>} : vector<2x32xf32>, vector<32x96xf32>, vector<2x96xf32> -> vector<2x96xf32>
    %11 = vector.extract_strided_slice %9 {offsets = [0, 0], sizes = [2, 32], strides = [1, 1]} : vector<2x96xf32> to vector<2x32xf32>
    %12 = vector.extract_strided_slice %10 {offsets = [0, 0], sizes = [2, 32], strides = [1, 1]} : vector<2x96xf32> to vector<2x32xf32>
    %13 = arith.addf %11, %12 : vector<2x32xf32>
    %14 = arith.negf %13 : vector<2x32xf32>
    %15 = math.exp %14 : vector<2x32xf32>
    %cst_12 = arith.constant 1.000000e+00 : f32
    %16 = vector.broadcast %cst_12 : f32 to vector<2x32xf32>
    %17 = arith.addf %16, %15 : vector<2x32xf32>
    %18 = arith.divf %16, %17 : vector<2x32xf32>
    %19 = vector.extract_strided_slice %9 {offsets = [0, 32], sizes = [2, 32], strides = [1, 1]} : vector<2x96xf32> to vector<2x32xf32>
    %20 = vector.extract_strided_slice %10 {offsets = [0, 32], sizes = [2, 32], strides = [1, 1]} : vector<2x96xf32> to vector<2x32xf32>
    %21 = arith.addf %19, %20 : vector<2x32xf32>
    %22 = arith.negf %21 : vector<2x32xf32>
    %23 = math.exp %22 : vector<2x32xf32>
    %cst_13 = arith.constant 1.000000e+00 : f32
    %24 = vector.broadcast %cst_13 : f32 to vector<2x32xf32>
    %25 = arith.addf %24, %23 : vector<2x32xf32>
    %26 = arith.divf %24, %25 : vector<2x32xf32>
    %27 = vector.extract_strided_slice %9 {offsets = [0, 64], sizes = [2, 32], strides = [1, 1]} : vector<2x96xf32> to vector<2x32xf32>
    %28 = vector.extract_strided_slice %10 {offsets = [0, 64], sizes = [2, 32], strides = [1, 1]} : vector<2x96xf32> to vector<2x32xf32>
    %29 = vector.broadcast %2 : vector<1x32xf32> to vector<2x32xf32>
    %30 = arith.addf %28, %29 : vector<2x32xf32>
    %31 = arith.mulf %18, %30 : vector<2x32xf32>
    %32 = arith.addf %27, %31 : vector<2x32xf32>
    %33 = math.tanh %32 : vector<2x32xf32>
    %34 = arith.subf %8, %33 : vector<2x32xf32>
    %35 = arith.mulf %26, %34 : vector<2x32xf32>
    %36 = arith.addf %33, %35 : vector<2x32xf32>
    %c0_14 = arith.constant 0 : index
    %c0_15 = arith.constant 0 : index
    %37 = vector.load %arg10[%c0_14, %c0_15] : memref<16x32xf32, #tpu.memory_space<vmem>>, vector<2x32xf32>
    tpu.vector_store %arg10[%c0_14, %c0_15], %36 {strides = array<i32>} : memref<16x32xf32, #tpu.memory_space<vmem>>, vector<2x32xf32>,
    %38 = vector.extract_strided_slice %7 {offsets = [2, 0], sizes = [2, 96], strides = [1, 1]} : vector<16x96xf32> to vector<2x96xf32>
    %cst_16 = arith.constant dense<0.000000e+00> : vector<2x96xf32>
    %39 = tpu.matmul %36, %1, %cst_16 {dimension_numbers = #tpu.dot_dimension_numbers<[1], [0], [0], [1], [0, 0, 1, 1], [], []>} : vector<2x32xf32>, vector<32x96xf32>, vector<2x96xf32> -> vector<2x96xf32>
    %40 = vector.extract_strided_slice %38 {offsets = [0, 0], sizes = [2, 32], strides = [1, 1]} : vector<2x96xf32> to vector<2x32xf32>
    %41 = vector.extract_strided_slice %39 {offsets = [0, 0], sizes = [2, 32], strides = [1, 1]} : vector<2x96xf32> to vector<2x32xf32>
    %42 = arith.addf %40, %41 : vector<2x32xf32>
    %43 = arith.negf %42 : vector<2x32xf32>
    %44 = math.exp %43 : vector<2x32xf32>
    %cst_17 = arith.constant 1.000000e+00 : f32
    %45 = vector.broadcast %cst_17 : f32 to vector<2x32xf32>
    %46 = arith.addf %45, %44 : vector<2x32xf32>
    %47 = arith.divf %45, %46 : vector<2x32xf32>
    %48 = vector.extract_strided_slice %38 {offsets = [0, 32], sizes = [2, 32], strides = [1, 1]} : vector<2x96xf32> to vector<2x32xf32>
    %49 = vector.extract_strided_slice %39 {offsets = [0, 32], sizes = [2, 32], strides = [1, 1]} : vector<2x96xf32> to vector<2x32xf32>
    %50 = arith.addf %48, %49 : vector<2x32xf32>
    %51 = arith.negf %50 : vector<2x32xf32>
    %52 = math.exp %51 : vector<2x32xf32>
    %cst_18 = arith.constant 1.000000e+00 : f32
    %53 = vector.broadcast %cst_18 : f32 to vector<2x32xf32>
    %54 = arith.addf %53, %52 : vector<2x32xf32>
    %55 = arith.divf %53, %54 : vector<2x32xf32>
    %56 = vector.extract_strided_slice %38 {offsets = [0, 64], sizes = [2, 32], strides = [1, 1]} : vector<2x96xf32> to vector<2x32xf32>
    %57 = vector.extract_strided_slice %39 {offsets = [0, 64], sizes = [2, 32], strides = [1, 1]} : vector<2x96xf32> to vector<2x32xf32>
    %58 = vector.broadcast %2 : vector<1x32xf32> to vector<2x32xf32>
    %59 = arith.addf %57, %58 : vector<2x32xf32>
    %60 = arith.mulf %47, %59 : vector<2x32xf32>
    %61 = arith.addf %56, %60 : vector<2x32xf32>
    %62 = math.tanh %61 : vector<2x32xf32>
    %63 = arith.subf %36, %62 : vector<2x32xf32>
    %64 = arith.mulf %55, %63 : vector<2x32xf32>
    %65 = arith.addf %62, %64 : vector<2x32xf32>
    %c2 = arith.constant 2 : index
    %c0_19 = arith.constant 0 : index
    %66 = vector.load %arg10[%c2, %c0_19] : memref<16x32xf32, #tpu.memory_space<vmem>>, vector<2x32xf32>
    tpu.vector_store %arg10[%c2, %c0_19], %65 {strides = array<i32>} : memref<16x32xf32, #tpu.memory_space<vmem>>, vector<2x32xf32>,
    %67 = vector.extract_strided_slice %7 {offsets = [4, 0], sizes = [2, 96], strides = [1, 1]} : vector<16x96xf32> to vector<2x96xf32>
    %cst_20 = arith.constant dense<0.000000e+00> : vector<2x96xf32>
    %68 = tpu.matmul %65, %1, %cst_20 {dimension_numbers = #tpu.dot_dimension_numbers<[1], [0], [0], [1], [0, 0, 1, 1], [], []>} : vector<2x32xf32>, vector<32x96xf32>, vector<2x96xf32> -> vector<2x96xf32>
    %69 = vector.extract_strided_slice %67 {offsets = [0, 0], sizes = [2, 32], strides = [1, 1]} : vector<2x96xf32> to vector<2x32xf32>
    %70 = vector.extract_strided_slice %68 {offsets = [0, 0], sizes = [2, 32], strides = [1, 1]} : vector<2x96xf32> to vector<2x32xf32>
    %71 = arith.addf %69, %70 : vector<2x32xf32>
    %72 = arith.negf %71 : vector<2x32xf32>
    %73 = math.exp %72 : vector<2x32xf32>
    %cst_21 = arith.constant 1.000000e+00 : f32
    %74 = vector.broadcast %cst_21 : f32 to vector<2x32xf32>
    %75 = arith.addf %74, %73 : vector<2x32xf32>
    %76 = arith.divf %74, %75 : vector<2x32xf32>
    %77 = vector.extract_strided_slice %67 {offsets = [0, 32], sizes = [2, 32], strides = [1, 1]} : vector<2x96xf32> to vector<2x32xf32>
    %78 = vector.extract_strided_slice %68 {offsets = [0, 32], sizes = [2, 32], strides = [1, 1]} : vector<2x96xf32> to vector<2x32xf32>
    %79 = arith.addf %77, %78 : vector<2x32xf32>
    %80 = arith.negf %79 : vector<2x32xf32>
    %81 = math.exp %80 : vector<2x32xf32>
    %cst_22 = arith.constant 1.000000e+00 : f32
    %82 = vector.broadcast %cst_22 : f32 to vector<2x32xf32>
    %83 = arith.addf %82, %81 : vector<2x32xf32>
    %84 = arith.divf %82, %83 : vector<2x32xf32>
    %85 = vector.extract_strided_slice %67 {offsets = [0, 64], sizes = [2, 32], strides = [1, 1]} : vector<2x96xf32> to vector<2x32xf32>
    %86 = vector.extract_strided_slice %68 {offsets = [0, 64], sizes = [2, 32], strides = [1, 1]} : vector<2x96xf32> to vector<2x32xf32>
    %87 = vector.broadcast %2 : vector<1x32xf32> to vector<2x32xf32>
    %88 = arith.addf %86, %87 : vector<2x32xf32>
    %89 = arith.mulf %76, %88 : vector<2x32xf32>
    %90 = arith.addf %85, %89 : vector<2x32xf32>
    %91 = math.tanh %90 : vector<2x32xf32>
    %92 = arith.subf %65, %91 : vector<2x32xf32>
    %93 = arith.mulf %84, %92 : vector<2x32xf32>
    %94 = arith.addf %91, %93 : vector<2x32xf32>
    %c4 = arith.constant 4 : index
    %c0_23 = arith.constant 0 : index
    %95 = vector.load %arg10[%c4, %c0_23] : memref<16x32xf32, #tpu.memory_space<vmem>>, vector<2x32xf32>
    tpu.vector_store %arg10[%c4, %c0_23], %94 {strides = array<i32>} : memref<16x32xf32, #tpu.memory_space<vmem>>, vector<2x32xf32>,
    %96 = vector.extract_strided_slice %7 {offsets = [6, 0], sizes = [2, 96], strides = [1, 1]} : vector<16x96xf32> to vector<2x96xf32>
    %cst_24 = arith.constant dense<0.000000e+00> : vector<2x96xf32>
    %97 = tpu.matmul %94, %1, %cst_24 {dimension_numbers = #tpu.dot_dimension_numbers<[1], [0], [0], [1], [0, 0, 1, 1], [], []>} : vector<2x32xf32>, vector<32x96xf32>, vector<2x96xf32> -> vector<2x96xf32>
    %98 = vector.extract_strided_slice %96 {offsets = [0, 0], sizes = [2, 32], strides = [1, 1]} : vector<2x96xf32> to vector<2x32xf32>
    %99 = vector.extract_strided_slice %97 {offsets = [0, 0], sizes = [2, 32], strides = [1, 1]} : vector<2x96xf32> to vector<2x32xf32>
    %100 = arith.addf %98, %99 : vector<2x32xf32>
    %101 = arith.negf %100 : vector<2x32xf32>
    %102 = math.exp %101 : vector<2x32xf32>
    %cst_25 = arith.constant 1.000000e+00 : f32
    %103 = vector.broadcast %cst_25 : f32 to vector<2x32xf32>
    %104 = arith.addf %103, %102 : vector<2x32xf32>
    %105 = arith.divf %103, %104 : vector<2x32xf32>
    %106 = vector.extract_strided_slice %96 {offsets = [0, 32], sizes = [2, 32], strides = [1, 1]} : vector<2x96xf32> to vector<2x32xf32>
    %107 = vector.extract_strided_slice %97 {offsets = [0, 32], sizes = [2, 32], strides = [1, 1]} : vector<2x96xf32> to vector<2x32xf32>
    %108 = arith.addf %106, %107 : vector<2x32xf32>
    %109 = arith.negf %108 : vector<2x32xf32>
    %110 = math.exp %109 : vector<2x32xf32>
    %cst_26 = arith.constant 1.000000e+00 : f32
    %111 = vector.broadcast %cst_26 : f32 to vector<2x32xf32>
    %112 = arith.addf %111, %110 : vector<2x32xf32>
    %113 = arith.divf %111, %112 : vector<2x32xf32>
    %114 = vector.extract_strided_slice %96 {offsets = [0, 64], sizes = [2, 32], strides = [1, 1]} : vector<2x96xf32> to vector<2x32xf32>
    %115 = vector.extract_strided_slice %97 {offsets = [0, 64], sizes = [2, 32], strides = [1, 1]} : vector<2x96xf32> to vector<2x32xf32>
    %116 = vector.broadcast %2 : vector<1x32xf32> to vector<2x32xf32>
    %117 = arith.addf %115, %116 : vector<2x32xf32>
    %118 = arith.mulf %105, %117 : vector<2x32xf32>
    %119 = arith.addf %114, %118 : vector<2x32xf32>
    %120 = math.tanh %119 : vector<2x32xf32>
    %121 = arith.subf %94, %120 : vector<2x32xf32>
    %122 = arith.mulf %113, %121 : vector<2x32xf32>
    %123 = arith.addf %120, %122 : vector<2x32xf32>
    %c6 = arith.constant 6 : index
    %c0_27 = arith.constant 0 : index
    %124 = vector.load %arg10[%c6, %c0_27] : memref<16x32xf32, #tpu.memory_space<vmem>>, vector<2x32xf32>
    tpu.vector_store %arg10[%c6, %c0_27], %123 {strides = array<i32>} : memref<16x32xf32, #tpu.memory_space<vmem>>, vector<2x32xf32>,
    %125 = vector.extract_strided_slice %7 {offsets = [8, 0], sizes = [2, 96], strides = [1, 1]} : vector<16x96xf32> to vector<2x96xf32>
    %cst_28 = arith.constant dense<0.000000e+00> : vector<2x96xf32>
    %126 = tpu.matmul %123, %1, %cst_28 {dimension_numbers = #tpu.dot_dimension_numbers<[1], [0], [0], [1], [0, 0, 1, 1], [], []>} : vector<2x32xf32>, vector<32x96xf32>, vector<2x96xf32> -> vector<2x96xf32>
    %127 = vector.extract_strided_slice %125 {offsets = [0, 0], sizes = [2, 32], strides = [1, 1]} : vector<2x96xf32> to vector<2x32xf32>
    %128 = vector.extract_strided_slice %126 {offsets = [0, 0], sizes = [2, 32], strides = [1, 1]} : vector<2x96xf32> to vector<2x32xf32>
    %129 = arith.addf %127, %128 : vector<2x32xf32>
    %130 = arith.negf %129 : vector<2x32xf32>
    %131 = math.exp %130 : vector<2x32xf32>
    %cst_29 = arith.constant 1.000000e+00 : f32
    %132 = vector.broadcast %cst_29 : f32 to vector<2x32xf32>
    %133 = arith.addf %132, %131 : vector<2x32xf32>
    %134 = arith.divf %132, %133 : vector<2x32xf32>
    %135 = vector.extract_strided_slice %125 {offsets = [0, 32], sizes = [2, 32], strides = [1, 1]} : vector<2x96xf32> to vector<2x32xf32>
    %136 = vector.extract_strided_slice %126 {offsets = [0, 32], sizes = [2, 32], strides = [1, 1]} : vector<2x96xf32> to vector<2x32xf32>
    %137 = arith.addf %135, %136 : vector<2x32xf32>
    %138 = arith.negf %137 : vector<2x32xf32>
    %139 = math.exp %138 : vector<2x32xf32>
    %cst_30 = arith.constant 1.000000e+00 : f32
    %140 = vector.broadcast %cst_30 : f32 to vector<2x32xf32>
    %141 = arith.addf %140, %139 : vector<2x32xf32>
    %142 = arith.divf %140, %141 : vector<2x32xf32>
    %143 = vector.extract_strided_slice %125 {offsets = [0, 64], sizes = [2, 32], strides = [1, 1]} : vector<2x96xf32> to vector<2x32xf32>
    %144 = vector.extract_strided_slice %126 {offsets = [0, 64], sizes = [2, 32], strides = [1, 1]} : vector<2x96xf32> to vector<2x32xf32>
    %145 = vector.broadcast %2 : vector<1x32xf32> to vector<2x32xf32>
    %146 = arith.addf %144, %145 : vector<2x32xf32>
    %147 = arith.mulf %134, %146 : vector<2x32xf32>
    %148 = arith.addf %143, %147 : vector<2x32xf32>
    %149 = math.tanh %148 : vector<2x32xf32>
    %150 = arith.subf %123, %149 : vector<2x32xf32>
    %151 = arith.mulf %142, %150 : vector<2x32xf32>
    %152 = arith.addf %149, %151 : vector<2x32xf32>
    %c8 = arith.constant 8 : index
    %c0_31 = arith.constant 0 : index
    %153 = vector.load %arg10[%c8, %c0_31] : memref<16x32xf32, #tpu.memory_space<vmem>>, vector<2x32xf32>
    tpu.vector_store %arg10[%c8, %c0_31], %152 {strides = array<i32>} : memref<16x32xf32, #tpu.memory_space<vmem>>, vector<2x32xf32>,
    %154 = vector.extract_strided_slice %7 {offsets = [10, 0], sizes = [2, 96], strides = [1, 1]} : vector<16x96xf32> to vector<2x96xf32>
    %cst_32 = arith.constant dense<0.000000e+00> : vector<2x96xf32>
    %155 = tpu.matmul %152, %1, %cst_32 {dimension_numbers = #tpu.dot_dimension_numbers<[1], [0], [0], [1], [0, 0, 1, 1], [], []>} : vector<2x32xf32>, vector<32x96xf32>, vector<2x96xf32> -> vector<2x96xf32>
    %156 = vector.extract_strided_slice %154 {offsets = [0, 0], sizes = [2, 32], strides = [1, 1]} : vector<2x96xf32> to vector<2x32xf32>
    %157 = vector.extract_strided_slice %155 {offsets = [0, 0], sizes = [2, 32], strides = [1, 1]} : vector<2x96xf32> to vector<2x32xf32>
    %158 = arith.addf %156, %157 : vector<2x32xf32>
    %159 = arith.negf %158 : vector<2x32xf32>
    %160 = math.exp %159 : vector<2x32xf32>
    %cst_33 = arith.constant 1.000000e+00 : f32
    %161 = vector.broadcast %cst_33 : f32 to vector<2x32xf32>
    %162 = arith.addf %161, %160 : vector<2x32xf32>
    %163 = arith.divf %161, %162 : vector<2x32xf32>
    %164 = vector.extract_strided_slice %154 {offsets = [0, 32], sizes = [2, 32], strides = [1, 1]} : vector<2x96xf32> to vector<2x32xf32>
    %165 = vector.extract_strided_slice %155 {offsets = [0, 32], sizes = [2, 32], strides = [1, 1]} : vector<2x96xf32> to vector<2x32xf32>
    %166 = arith.addf %164, %165 : vector<2x32xf32>
    %167 = arith.negf %166 : vector<2x32xf32>
    %168 = math.exp %167 : vector<2x32xf32>
    %cst_34 = arith.constant 1.000000e+00 : f32
    %169 = vector.broadcast %cst_34 : f32 to vector<2x32xf32>
    %170 = arith.addf %169, %168 : vector<2x32xf32>
    %171 = arith.divf %169, %170 : vector<2x32xf32>
    %172 = vector.extract_strided_slice %154 {offsets = [0, 64], sizes = [2, 32], strides = [1, 1]} : vector<2x96xf32> to vector<2x32xf32>
    %173 = vector.extract_strided_slice %155 {offsets = [0, 64], sizes = [2, 32], strides = [1, 1]} : vector<2x96xf32> to vector<2x32xf32>
    %174 = vector.broadcast %2 : vector<1x32xf32> to vector<2x32xf32>
    %175 = arith.addf %173, %174 : vector<2x32xf32>
    %176 = arith.mulf %163, %175 : vector<2x32xf32>
    %177 = arith.addf %172, %176 : vector<2x32xf32>
    %178 = math.tanh %177 : vector<2x32xf32>
    %179 = arith.subf %152, %178 : vector<2x32xf32>
    %180 = arith.mulf %171, %179 : vector<2x32xf32>
    %181 = arith.addf %178, %180 : vector<2x32xf32>
    %c10 = arith.constant 10 : index
    %c0_35 = arith.constant 0 : index
    %182 = vector.load %arg10[%c10, %c0_35] : memref<16x32xf32, #tpu.memory_space<vmem>>, vector<2x32xf32>
    tpu.vector_store %arg10[%c10, %c0_35], %181 {strides = array<i32>} : memref<16x32xf32, #tpu.memory_space<vmem>>, vector<2x32xf32>,
    %183 = vector.extract_strided_slice %7 {offsets = [12, 0], sizes = [2, 96], strides = [1, 1]} : vector<16x96xf32> to vector<2x96xf32>
    %cst_36 = arith.constant dense<0.000000e+00> : vector<2x96xf32>
    %184 = tpu.matmul %181, %1, %cst_36 {dimension_numbers = #tpu.dot_dimension_numbers<[1], [0], [0], [1], [0, 0, 1, 1], [], []>} : vector<2x32xf32>, vector<32x96xf32>, vector<2x96xf32> -> vector<2x96xf32>
    %185 = vector.extract_strided_slice %183 {offsets = [0, 0], sizes = [2, 32], strides = [1, 1]} : vector<2x96xf32> to vector<2x32xf32>
    %186 = vector.extract_strided_slice %184 {offsets = [0, 0], sizes = [2, 32], strides = [1, 1]} : vector<2x96xf32> to vector<2x32xf32>
    %187 = arith.addf %185, %186 : vector<2x32xf32>
    %188 = arith.negf %187 : vector<2x32xf32>
    %189 = math.exp %188 : vector<2x32xf32>
    %cst_37 = arith.constant 1.000000e+00 : f32
    %190 = vector.broadcast %cst_37 : f32 to vector<2x32xf32>
    %191 = arith.addf %190, %189 : vector<2x32xf32>
    %192 = arith.divf %190, %191 : vector<2x32xf32>
    %193 = vector.extract_strided_slice %183 {offsets = [0, 32], sizes = [2, 32], strides = [1, 1]} : vector<2x96xf32> to vector<2x32xf32>
    %194 = vector.extract_strided_slice %184 {offsets = [0, 32], sizes = [2, 32], strides = [1, 1]} : vector<2x96xf32> to vector<2x32xf32>
    %195 = arith.addf %193, %194 : vector<2x32xf32>
    %196 = arith.negf %195 : vector<2x32xf32>
    %197 = math.exp %196 : vector<2x32xf32>
    %cst_38 = arith.constant 1.000000e+00 : f32
    %198 = vector.broadcast %cst_38 : f32 to vector<2x32xf32>
    %199 = arith.addf %198, %197 : vector<2x32xf32>
    %200 = arith.divf %198, %199 : vector<2x32xf32>
    %201 = vector.extract_strided_slice %183 {offsets = [0, 64], sizes = [2, 32], strides = [1, 1]} : vector<2x96xf32> to vector<2x32xf32>
    %202 = vector.extract_strided_slice %184 {offsets = [0, 64], sizes = [2, 32], strides = [1, 1]} : vector<2x96xf32> to vector<2x32xf32>
    %203 = vector.broadcast %2 : vector<1x32xf32> to vector<2x32xf32>
    %204 = arith.addf %202, %203 : vector<2x32xf32>
    %205 = arith.mulf %192, %204 : vector<2x32xf32>
    %206 = arith.addf %201, %205 : vector<2x32xf32>
    %207 = math.tanh %206 : vector<2x32xf32>
    %208 = arith.subf %181, %207 : vector<2x32xf32>
    %209 = arith.mulf %200, %208 : vector<2x32xf32>
    %210 = arith.addf %207, %209 : vector<2x32xf32>
    %c12 = arith.constant 12 : index
    %c0_39 = arith.constant 0 : index
    %211 = vector.load %arg10[%c12, %c0_39] : memref<16x32xf32, #tpu.memory_space<vmem>>, vector<2x32xf32>
    tpu.vector_store %arg10[%c12, %c0_39], %210 {strides = array<i32>} : memref<16x32xf32, #tpu.memory_space<vmem>>, vector<2x32xf32>,
    %212 = vector.extract_strided_slice %7 {offsets = [14, 0], sizes = [2, 96], strides = [1, 1]} : vector<16x96xf32> to vector<2x96xf32>
    %cst_40 = arith.constant dense<0.000000e+00> : vector<2x96xf32>
    %213 = tpu.matmul %210, %1, %cst_40 {dimension_numbers = #tpu.dot_dimension_numbers<[1], [0], [0], [1], [0, 0, 1, 1], [], []>} : vector<2x32xf32>, vector<32x96xf32>, vector<2x96xf32> -> vector<2x96xf32>
    %214 = vector.extract_strided_slice %212 {offsets = [0, 0], sizes = [2, 32], strides = [1, 1]} : vector<2x96xf32> to vector<2x32xf32>
    %215 = vector.extract_strided_slice %213 {offsets = [0, 0], sizes = [2, 32], strides = [1, 1]} : vector<2x96xf32> to vector<2x32xf32>
    %216 = arith.addf %214, %215 : vector<2x32xf32>
    %217 = arith.negf %216 : vector<2x32xf32>
    %218 = math.exp %217 : vector<2x32xf32>
    %cst_41 = arith.constant 1.000000e+00 : f32
    %219 = vector.broadcast %cst_41 : f32 to vector<2x32xf32>
    %220 = arith.addf %219, %218 : vector<2x32xf32>
    %221 = arith.divf %219, %220 : vector<2x32xf32>
    %222 = vector.extract_strided_slice %212 {offsets = [0, 32], sizes = [2, 32], strides = [1, 1]} : vector<2x96xf32> to vector<2x32xf32>
    %223 = vector.extract_strided_slice %213 {offsets = [0, 32], sizes = [2, 32], strides = [1, 1]} : vector<2x96xf32> to vector<2x32xf32>
    %224 = arith.addf %222, %223 : vector<2x32xf32>
    %225 = arith.negf %224 : vector<2x32xf32>
    %226 = math.exp %225 : vector<2x32xf32>
    %cst_42 = arith.constant 1.000000e+00 : f32
    %227 = vector.broadcast %cst_42 : f32 to vector<2x32xf32>
    %228 = arith.addf %227, %226 : vector<2x32xf32>
    %229 = arith.divf %227, %228 : vector<2x32xf32>
    %230 = vector.extract_strided_slice %212 {offsets = [0, 64], sizes = [2, 32], strides = [1, 1]} : vector<2x96xf32> to vector<2x32xf32>
    %231 = vector.extract_strided_slice %213 {offsets = [0, 64], sizes = [2, 32], strides = [1, 1]} : vector<2x96xf32> to vector<2x32xf32>
    %232 = vector.broadcast %2 : vector<1x32xf32> to vector<2x32xf32>
    %233 = arith.addf %231, %232 : vector<2x32xf32>
    %234 = arith.mulf %221, %233 : vector<2x32xf32>
    %235 = arith.addf %230, %234 : vector<2x32xf32>
    %236 = math.tanh %235 : vector<2x32xf32>
    %237 = arith.subf %210, %236 : vector<2x32xf32>
    %238 = arith.mulf %229, %237 : vector<2x32xf32>
    %239 = arith.addf %236, %238 : vector<2x32xf32>
    %c14 = arith.constant 14 : index
    %c0_43 = arith.constant 0 : index
    %240 = vector.load %arg10[%c14, %c0_43] : memref<16x32xf32, #tpu.memory_space<vmem>>, vector<2x32xf32>
    tpu.vector_store %arg10[%c14, %c0_43], %239 {strides = array<i32>} : memref<16x32xf32, #tpu.memory_space<vmem>>, vector<2x32xf32>,
    %c0_44 = arith.constant 0 : index
    %c0_45 = arith.constant 0 : index
    %241 = vector.load %arg11[%c0_44, %c0_45] : memref<2x32xf32, #tpu.memory_space<vmem>>, vector<2x32xf32>
    tpu.vector_store %arg11[%c0_44, %c0_45], %239 {strides = array<i32>} : memref<2x32xf32, #tpu.memory_space<vmem>>, vector<2x32xf32>,
    %c0_46 = arith.constant 0 : index
    %c0_47 = arith.constant 0 : index
    %242 = vector.load %arg10[%c0_46, %c0_47] : memref<16x32xf32, #tpu.memory_space<vmem>>, vector<16x32xf32>
    %c0_48 = arith.constant 0 : index
    %c0_49 = arith.constant 0 : index
    %243 = vector.load %arg7[%c0_48, %c0_49] : memref<32x1xf32, #tpu.memory_space<vmem>>, vector<32x1xf32>
    %cst_50 = arith.constant dense<0.000000e+00> : vector<16x1xf32>
    %244 = tpu.matmul %242, %243, %cst_50 {dimension_numbers = #tpu.dot_dimension_numbers<[1], [0], [0], [1], [0, 0, 1, 1], [], []>} : vector<16x32xf32>, vector<32x1xf32>, vector<16x1xf32> -> vector<16x1xf32>
    %c0_51 = arith.constant 0 : index
    %c0_52 = arith.constant 0 : index
    %245 = vector.load %arg8[%c0_51, %c0_52] : memref<1x1xf32, #tpu.memory_space<vmem>>, vector<1x1xf32>
    %246 = vector.broadcast %245 : vector<1x1xf32> to vector<16x1xf32>
    %247 = arith.addf %244, %246 : vector<16x1xf32>
    %c0_53 = arith.constant 0 : index
    %c0_54 = arith.constant 0 : index
    %248 = vector.load %arg9[%c0_53, %c0_54] : memref<16x1xf32, #tpu.memory_space<vmem>>, vector<16x1xf32>
    tpu.vector_store %arg9[%c0_53, %c0_54], %247 {strides = array<i32>} : memref<16x1xf32, #tpu.memory_space<vmem>>, vector<16x1xf32>,
    return
  }
  func.func @transform_0(%arg0: i32) -> (i32, i32) {
    %c0_i32 = arith.constant 0 : i32
    %c0_i32_0 = arith.constant 0 : i32
    %c0_i32_1 = arith.constant 0 : i32
    return %c0_i32, %c0_i32_0 : i32, i32
  }
  func.func @transform_1(%arg0: i32) -> (i32, i32) {
    %c0_i32 = arith.constant 0 : i32
    %c0_i32_0 = arith.constant 0 : i32
    %c0_i32_1 = arith.constant 0 : i32
    return %c0_i32, %c0_i32_0 : i32, i32
  }
  func.func @transform_2(%arg0: i32) -> (i32, i32) {
    %c0_i32 = arith.constant 0 : i32
    %c0_i32_0 = arith.constant 0 : i32
    %c0_i32_1 = arith.constant 0 : i32
    return %c0_i32, %c0_i32_0 : i32, i32
  }
  func.func @transform_3(%arg0: i32) -> (i32, i32) {
    %c0_i32 = arith.constant 0 : i32
    %c0_i32_0 = arith.constant 0 : i32
    %c0_i32_1 = arith.constant 0 : i32
    return %c0_i32, %c0_i32_0 : i32, i32
  }
  func.func @transform_4(%arg0: i32) -> (i32, i32) {
    %c0_i32 = arith.constant 0 : i32
    %c0_i32_0 = arith.constant 0 : i32
    %c0_i32_1 = arith.constant 0 : i32
    return %c0_i32, %c0_i32_0 : i32, i32
  }
  func.func @transform_5(%arg0: i32) -> (i32, i32) {
    %c0_i32 = arith.constant 0 : i32
    %c0_i32_0 = arith.constant 0 : i32
    %c0_i32_1 = arith.constant 0 : i32
    return %c0_i32, %c0_i32_0 : i32, i32
  }
  func.func @transform_6(%arg0: i32) -> (i32, i32) {
    %c0_i32 = arith.constant 0 : i32
    %c0_i32_0 = arith.constant 0 : i32
    %c0_i32_1 = arith.constant 0 : i32
    return %c0_i32, %c0_i32_0 : i32, i32
  }
  func.func @transform_7(%arg0: i32) -> (i32, i32) {
    %c0_i32 = arith.constant 0 : i32
    %c0_i32_0 = arith.constant 0 : i32
    %c0_i32_1 = arith.constant 0 : i32
    return %c0_i32, %c0_i32_0 : i32, i32
  }
  func.func @transform_8(%arg0: i32) -> (i32, i32) {
    %c0_i32 = arith.constant 0 : i32
    %c0_i32_0 = arith.constant 0 : i32
    %c0_i32_1 = arith.constant 0 : i32
    return %c0_i32, %c0_i32_0 : i32, i32
  }
  func.func @transform_9(%arg0: i32) -> (i32, i32) {
    %c0_i32 = arith.constant 0 : i32
    %c0_i32_0 = arith.constant 0 : i32
    %c0_i32_1 = arith.constant 0 : i32
    return %c0_i32, %c0_i32_0 : i32, i32
  }
  func.func @transform_10(%arg0: i32) -> (i32, i32) {
    %c0_i32 = arith.constant 0 : i32
    %c0_i32_0 = arith.constant 0 : i32
    %c0_i32_1 = arith.constant 0 : i32
    return %c0_i32, %c0_i32_0 : i32, i32
  }
}

</mosaic_0001>

<bundles_post_ra>
// kernel: decoder_rnn2_forward.1
= control target key start
LH: loop header
LB: loop body
LE: loop exit
PB: predicated region body
PF: predicated region fallthrough
CT: control target
= control target key end

     0   :  { %s1308_s0 = inlined_call_operand.hbm [shape: f32[16,32], index: 0, kind: input, shape index: {}]   ;;  %s1309_s1 = inlined_call_operand.vmem [shape: f32[2,32], index: 1, kind: input, shape index: {}]   ;;  %s1310_s2 = inlined_call_operand.vmem [shape: f32[32,96], index: 2, kind: input, shape index: {}]   ;;  %s1311_s3 = inlined_call_operand.hbm [shape: f32[32,96], index: 3, kind: input, shape index: {}]   ;;  %s1312_s4 = inlined_call_operand.vmem [shape: f32[1,96], index: 4, kind: input, shape index: {}]   ;;  %s1313_s5 = inlined_call_operand.vmem [shape: f32[1,32], index: 5, kind: input, shape index: {}]   ;;  %s1314_s6 = inlined_call_operand.vmem [shape: f32[32,1], index: 6, kind: input, shape index: {}]   ;;  %s1315_s7 = inlined_call_operand.<no memory space> [shape: f32[1,1], index: 7, kind: input, shape index: {}]   ;;  %s1316_s8 = inlined_call_operand.vmem [shape: f32[16,1], index: 8, kind: output, shape index: {0}]   ;;  %s1317_s9 = inlined_call_operand.hbm [shape: f32[16,32], index: 9, kind: output, shape index: {1}]   ;;  %s1318_s10 = inlined_call_operand.hbm [shape: f32[2,32], index: 10, kind: output, shape index: {2}]  }
   0x1   :  { %v16_v0 = vstv %s1315_s7 }
   0x2   :  { %17 = vst [vmem:[#allocation2] sm:$0x1] %v16_v0 }
   0x3   :  { %18 = vsyncpa [#allocation4], 0 }
   0x4   :  { %19 = vsyncpa [#allocation7], 0 }
   0x5   :  { %20 = vsyncpa [#allocation5], 0 }
   0x6   :  { %21 = vsyncpa [#allocation10], 0  ;;  %s26_s17 = sshll.u32 %s1308_s0, 4  ;;  %s1022_s18 = smov [#allocation3]   ;;  %s27_s17 = int_to_ptr.hbm [resolvable:$true] %s26_s17 }
   0x7   :  { %s28_s19 = sshll.u32 %s1022_s18, 4  ;;  %s43_s22 = sshll.u32 %s1311_s3, 4  ;;  %s29_s19 = int_to_ptr.vmem [resolvable:$true] %s28_s19  ;;  %s44_s22 = int_to_ptr.hbm [resolvable:$true] %s43_s22 }
   0x8   :  { %s1023_s23 = smov 128   ;;  %s1024_s24 = smov 8  }
   0x9   :  { %34 = dma.hbm_to_vmem [thread:$0]  %s27_s17, 256, %s29_s19, [#allocation4], %s1023_s23, %s1023_s23, %s1024_s24  }
   0xa   :  { %s1025_s7 = smov [#allocation6]  }
   0xb   :  { %s45_s25 = sshll.u32 %s1025_s7, 4  ;;  %s46_s25 = int_to_ptr.vmem [resolvable:$true] %s45_s25 }
   0xc   :  { %51 = dma.hbm_to_vmem [thread:$0]  %s44_s22, 512, %s46_s25, [#allocation7], %s1023_s23, %s1023_s23, %s1024_s24  }
   0xd   :  { %1014 = dma.done.wait [#allocation4], 256  }
   0xe   :  { %1015 = vsyncadd [#allocation4], 4294967040 }
   0xf   :  { %1016 = dma.done.wait [#allocation7], 512  }
  0x10   :  { %1017 = vsyncadd [#allocation7], 4294966784  ;;  %v71_v1 = vld [vmem:[%s1310_s2 + $0x18] sm:$0xff]  ;;  %v1104_v2 = vld [vmem:[#allocation6 + $0x18] sm:$0xff]  ;;  %vm83_vm0 = vcmask 261120   ;;  %vm193_vm5 = vcmask 254976  }
  0x11   :  { %v70_v3 = vld [vmem:[%s1310_s2 + $0x10] sm:$0xff]  ;;  %102 = vmatpush.msra.mxu0 %v71_v1  ;;  %129 = vmatpush.msra.mxu1 %v1104_v2  ;;  %v1110_v4 = vld [vmem:[#allocation6 + $0x10] sm:$0xff]  ;;  %v1115_v6 = vld [vmem:[#allocation6 + $0x8] sm:$0xff]  ;;  %s1028_s16 = smov 96   ;;  %s1029_s0 = smov [#allocation8]  }
  0x12   :  { %v69_v5 = vld [vmem:[%s1310_s2 + $0x8] sm:$0xff]  ;;  %209 = vmatpush.msra.mxu3 %v1104_v2  ;;  %455 = vmatpush.msra.mxu2 %v1104_v2  ;;  %v68_v7 = vld [vmem:[%s1310_s2] sm:$0xff]  ;;  %v1126_v9 = vld [vmem:[#allocation6] sm:$0xff]  ;;  %s1026_s2 = smov 64   ;;  %s806_s27 = sshll.u32 %s1317_s9, 4  ;;  %s807_s27 = int_to_ptr.hbm [resolvable:$true] %s806_s27 }
  0x13   :  { %103 = vmatpush.msra.mxu0 %v70_v3  ;;  %130 = vmatpush.msra.mxu1 %v1110_v4  ;;  %v867_v8 = vld [vmem:[%s1313_s5] ss:$0 sm:$0xff]  ;;  %v77_v10 = vld [vmem:[#allocation3] sm:$0xff]  ;;  %s1030_s28 = smov [#allocation9]   ;;  %s820_s12 = sshll.u32 %s1318_s10, 4  ;;  %s821_s12 = int_to_ptr.hbm [resolvable:$true] %s820_s12 }
  0x14   :  { %210 = vmatpush.msra.mxu3 %v1110_v4  ;;  %456 = vmatpush.msra.mxu2 %v1110_v4  ;;  %v1134_v11 = vld [vmem:[%s1309_s1] sm:$0x3]  ;;  %s818_s29 = sshll.u32 %s1030_s28, 4  ;;  %s819_s29 = int_to_ptr.vmem [resolvable:$true] %s818_s29 }
  0x15   :  { %104 = vmatpush.msra.mxu0 %v69_v5  ;;  %131 = vmatpush.msra.mxu1 %v1115_v6  ;;  %v1168_v15 = vld [vmem:[%s1312_s4] ss:$0 sm:$0xff]  ;;  %s1027_s4 = smov 32  }
  0x16   :  { %159 = vrot.lane.b32.xlu0 %v867_v8, %s1026_s2  ;;  %211 = vmatpush.msra.mxu3 %v1115_v6 }
  0x17   :  { %105 = vmatpush.msra.mxu0 %v68_v7  ;;  %132 = vmatpush.msra.mxu1 %v1126_v9 }
  0x18   :  { %838 = vmatmul.msk.f32.vlgmr.msra.gmra.mxu0 %vm83_vm0, %v77_v10  ;;  %840 = vmatmul.msk.f32.vlgmr.msra.gmra.mxu1 %vm83_vm0, %v1134_v11 }
  0x19   :  { %212 = vmatpush.msra.mxu3 %v1126_v9  ;;  %373 = vmatpush.msrb.mxu1 %v1104_v2 }
  0x1a   :  { %457 = vmatpush.msra.mxu2 %v1115_v6  ;;  %610 = vmatpush.msrb.mxu0 %v1104_v2 }
  0x1b   :  { %291 = vmatpush.msrb.mxu3 %v1104_v2  ;;  %374 = vmatpush.msrb.mxu1 %v1110_v4 }
  0x1c   :  { %458 = vmatpush.msra.mxu2 %v1126_v9  ;;  %611 = vmatpush.msrb.mxu0 %v1110_v4 }
  0x1d   :  { %292 = vmatpush.msrb.mxu3 %v1110_v4  ;;  %375 = vmatpush.msrb.mxu1 %v1115_v6 }
  0x1e   :  { %612 = vmatpush.msrb.mxu0 %v1115_v6 }
  0x1f   :  { %293 = vmatpush.msrb.mxu3 %v1115_v6  ;;  %376 = vmatpush.msrb.mxu1 %v1126_v9 }
  0x20   :  { %613 = vmatpush.msrb.mxu0 %v1126_v9 }
  0x21   :  { %294 = vmatpush.msrb.mxu3 %v1126_v9  ;;  %691 = vmatpush.msra.mxu1 %v1104_v2 }
  0x23   :  { %692 = vmatpush.msra.mxu1 %v1110_v4 }
  0x25   :  { %693 = vmatpush.msra.mxu1 %v1115_v6 }
  0x27   :  { %694 = vmatpush.msra.mxu1 %v1126_v9 }
  0x88   :  { %v1161_v12 = vpop.permute.xlu0 %159 }
  0x95   :  { %v134_v13 = vpop.f32.mrf.mxu1  ;;  %v107_v16 = vpop.f32.mrf.mxu0 }
  0x96   :  { %v162_v14 = vadd.f32 %v1161_v12, %v134_v13  ;;  %v1171_v17 = vadd.f32 %v1168_v15, %v107_v16 }
  0x98   :  { %164 = vrot.lane.b32.xlu0 %v162_v14, %s1026_s2  ;;  %v137_v18 = vadd.f32 %v134_v13, %v1171_v17 }
  0x9a   :  { %v841_v19 = vmul.f32 -1.442695, %v137_v18 }
  0x9c   :  { %870 = vpow2.f32 %v841_v19 }
  0xa2   :  { %v871_v20 = vpop.eup %870 }
  0xa3   :  { %v141_v21 = vadd.f32 1.0, %v871_v20 }
  0xa5   :  { %872 = vrcp.f32 %v141_v21  ;;  %v153_v27 = vand.u32 2147483648, %v141_v21  ;;  %vm147_vm2 = vweird.f32 %v141_v21  ;;  %v151_v28 = vand.u32 2147483647, %v141_v21 }
  0xa7   :  { %v154_v30 = vor.u32 1.1754944e-38, %v153_v27  ;;  %vm152_vm4 = vcmp.eq.f32.partialorder %v151_v28, 8.507059e+37 }
  0xab   :  { %v873_v22 = vpop.eup %872 }
  0xac   :  { %v143_v23 = vmul.f32 %v873_v22, %v141_v21  ;;  %vm148_vm1 = vweird.f32 %v873_v22 }
  0xad   :  { %vm149_vm3 = vmor %vm147_vm2, %vm148_vm1 }
  0xae   :  { %v144_v24 = vsub.f32 1.0, %v143_v23 }
  0xb0   :  { %v145_v25 = vmul.f32 %v873_v22, %v144_v24 }
  0xb2   :  { %v146_v26 = vadd.f32 %v873_v22, %v145_v25 }
  0xb4   :  { %v150_v29 = vsel %vm149_vm3, %v873_v22, %v146_v26 }
  0xb5   :  { %v155_v32 = vsel %vm152_vm4, %v154_v30, %v150_v29 }
 0x10a   :  { %v165_v31 = vpop.permute.xlu0 %164 }
 0x10b   :  { %v167_v33 = vmul.f32 %v165_v31, %v155_v32 }
 0x10d   :  { %169 = vrot.lane.b32.xlu1 %v167_v33, %s1026_s2 }
 0x17f   :  { %v170_v34 = vpop.permute.xlu1 %169 }
 0x180   :  { %v172_v35 = vadd.f32 %v170_v34, %v1171_v17 }
 0x182   :  { %874 = vtanh.f32 %v172_v35 }
 0x188   :  { %v875_v36 = vpop.eup %874 }
 0x189   :  { %175 = vrot.lane.b32.xlu1 %v875_v36, %s1026_s2 }
 0x1fb   :  { %v176_v37 = vpop.permute.xlu1 %175 }
 0x1fc   :  { %v178_v38 = vsub.f32 %v1134_v11, %v176_v37 }
 0x1fe   :  { %180 = vrot.lane.b32.xlu2 %v178_v38, %s1027_s4 }
 0x258   :  { %v181_v39 = vpop.permute.xlu2 %180 }
 0x259   :  { %v183_v40 = vmul.f32 %v181_v39, %v155_v32 }
 0x25b   :  { %185 = vrot.lane.b32.xlu2 %v183_v40, %s1027_s4 }
 0x2b5   :  { %v186_v41 = vpop.permute.xlu2 %185 }
 0x2b6   :  { %v188_v42 = vadd.f32 %v875_v36, %v186_v41 }
 0x2b8   :  { %190 = vrot.lane.b32.xlu0 %v188_v42, %s1026_s2 }
 0x32a   :  { %v191_v43 = vpop.permute.xlu0 %190 }
 0x32b   :  { %194 = vst.msk [vmem:[#allocation8] sm:$0x3] %vm193_vm5, %v191_v43  ;;  %842 = vmatmul.msk.f32.vlgmr.msra.gmra.mxu3 %vm83_vm0, %v191_v43 }
 0x32c   :  { %529 = vmatpush.msra.mxu3 %v1104_v2 }
 0x32e   :  { %530 = vmatpush.msra.mxu3 %v1110_v4 }
 0x330   :  { %531 = vmatpush.msra.mxu3 %v1115_v6 }
 0x332   :  { %532 = vmatpush.msra.mxu3 %v1126_v9 }
 0x3ae   :  { %v214_v44 = vpop.f32.mrf.mxu3 }
 0x3af   :  { %v240_v45 = vadd.f32 %v214_v44, %v1161_v12  ;;  %v218_v47 = vrot.slane %v214_v44, 6 }
 0x3b1   :  { %v242_v46 = vrot.slane %v240_v45, 6  ;;  %v220_v48 = vadd.f32 %v218_v47, %v1171_v17 }
 0x3b3   :  { %243 = vrot.lane.b32.xlu1 %v242_v46, %s1026_s2  ;;  %v843_v49 = vmul.f32 -1.442695, %v220_v48 }
 0x3b5   :  { %876 = vpow2.f32 %v843_v49 }
 0x3bb   :  { %v877_v50 = vpop.eup %876 }
 0x3bc   :  { %v224_v51 = vadd.f32 1.0, %v877_v50 }
 0x3be   :  { %878 = vrcp.f32 %v224_v51  ;;  %v236_v57 = vand.u32 2147483648, %v224_v51  ;;  %vm230_vm7 = vweird.f32 %v224_v51  ;;  %v234_v58 = vand.u32 2147483647, %v224_v51 }
 0x3c0   :  { %v237_v60 = vor.u32 1.1754944e-38, %v236_v57  ;;  %vm235_vm9 = vcmp.eq.f32.partialorder %v234_v58, 8.507059e+37 }
 0x3c4   :  { %v879_v52 = vpop.eup %878 }
 0x3c5   :  { %v226_v53 = vmul.f32 %v879_v52, %v224_v51  ;;  %vm231_vm6 = vweird.f32 %v879_v52 }
 0x3c6   :  { %vm232_vm8 = vmor %vm230_vm7, %vm231_vm6 }
 0x3c7   :  { %v227_v54 = vsub.f32 1.0, %v226_v53 }
 0x3c9   :  { %v228_v55 = vmul.f32 %v879_v52, %v227_v54 }
 0x3cb   :  { %v229_v56 = vadd.f32 %v879_v52, %v228_v55 }
 0x3cd   :  { %v233_v59 = vsel %vm232_vm8, %v879_v52, %v229_v56 }
 0x3ce   :  { %v238_v62 = vsel %vm235_vm9, %v237_v60, %v233_v59 }
 0x425   :  { %v244_v61 = vpop.permute.xlu1 %243 }
 0x426   :  { %v246_v63 = vmul.f32 %v244_v61, %v238_v62 }
 0x428   :  { %248 = vrot.lane.b32.xlu2 %v246_v63, %s1026_s2 }
 0x482   :  { %v249_v0 = vpop.permute.xlu2 %248 }
 0x483   :  { %v251_v1 = vadd.f32 %v249_v0, %v1171_v17 }
 0x485   :  { %880 = vtanh.f32 %v251_v1 }
 0x48b   :  { %v881_v2 = vpop.eup %880 }
 0x48c   :  { %v254_v3 = vrot.slane %v881_v2, 2 }
 0x48e   :  { %v256_v4 = vsub.f32 %v188_v42, %v254_v3 }
 0x490   :  { %v258_v5 = vrot.slane %v256_v4, 6 }
 0x492   :  { %259 = vrot.lane.b32.xlu0 %v258_v5, %s1028_s16 }
 0x504   :  { %v260_v6 = vpop.permute.xlu0 %259 }
 0x505   :  { %v262_v7 = vmul.f32 %v260_v6, %v238_v62 }
 0x507   :  { %264 = vrot.lane.b32.xlu1 %v262_v7, %s1027_s4 }
 0x579   :  { %v265_v8 = vpop.permute.xlu1 %264 }
 0x57a   :  { %v1194_v9 = vadd.f32 %v881_v2, %v265_v8 }
 0x57c   :  { %v274_v10 = vrot.slane %v1194_v9, 2 }
 0x57e   :  { %275 = vrot.lane.b32.xlu2 %v274_v10, %s1026_s2 }
 0x5d8   :  { %v276_v11 = vpop.permute.xlu2 %275 }
 0x5d9   :  { %844 = vmatmul.msk.f32.vlgmr.msrb.gmra.mxu3 %vm83_vm0, %v276_v11 }
 0x65c   :  { %v296_v13 = vpop.f32.mrf.mxu3 }
 0x65d   :  { %v322_v14 = vadd.f32 %v296_v13, %v1161_v12  ;;  %v300_v18 = vrot.slane %v296_v13, 4 }
 0x65f   :  { %v324_v16 = vrot.slane %v322_v14, 4  ;;  %v302_v19 = vadd.f32 %v300_v18, %v1171_v17 }
 0x661   :  { %325 = vrot.lane.b32.xlu0 %v324_v16, %s1026_s2  ;;  %v845_v20 = vmul.f32 -1.442695, %v302_v19 }
 0x663   :  { %882 = vpow2.f32 %v845_v20 }
 0x669   :  { %v883_v21 = vpop.eup %882 }
 0x66a   :  { %v306_v22 = vadd.f32 1.0, %v883_v21 }
 0x66c   :  { %884 = vrcp.f32 %v306_v22  ;;  %v318_v28 = vand.u32 2147483648, %v306_v22  ;;  %vm312_vm11 = vweird.f32 %v306_v22  ;;  %v316_v29 = vand.u32 2147483647, %v306_v22 }
 0x66e   :  { %v319_v31 = vor.u32 1.1754944e-38, %v318_v28  ;;  %vm317_vm13 = vcmp.eq.f32.partialorder %v316_v29, 8.507059e+37 }
 0x672   :  { %v885_v23 = vpop.eup %884 }
 0x673   :  { %v308_v24 = vmul.f32 %v885_v23, %v306_v22  ;;  %vm313_vm10 = vweird.f32 %v885_v23 }
 0x674   :  { %vm314_vm12 = vmor %vm312_vm11, %vm313_vm10 }
 0x675   :  { %v309_v25 = vsub.f32 1.0, %v308_v24 }
 0x677   :  { %v310_v26 = vmul.f32 %v885_v23, %v309_v25 }
 0x679   :  { %v311_v27 = vadd.f32 %v885_v23, %v310_v26 }
 0x67b   :  { %v315_v30 = vsel %vm314_vm12, %v885_v23, %v311_v27 }
 0x67c   :  { %v320_v33 = vsel %vm317_vm13, %v319_v31, %v315_v30 }
 0x6d3   :  { %v326_v32 = vpop.permute.xlu0 %325 }
 0x6d4   :  { %v328_v34 = vmul.f32 %v326_v32, %v320_v33 }
 0x6d6   :  { %330 = vrot.lane.b32.xlu1 %v328_v34, %s1026_s2 }
 0x748   :  { %v331_v35 = vpop.permute.xlu1 %330 }
 0x749   :  { %v333_v36 = vadd.f32 %v331_v35, %v1171_v17 }
 0x74b   :  { %886 = vtanh.f32 %v333_v36 }
 0x751   :  { %v887_v37 = vpop.eup %886 }
 0x752   :  { %v336_v38 = vrot.slane %v887_v37, 2 }
 0x754   :  { %v338_v39 = vsub.f32 %v1194_v9, %v336_v38 }
 0x756   :  { %v340_v40 = vrot.slane %v338_v39, 6 }
 0x758   :  { %341 = vrot.lane.b32.xlu2 %v340_v40, %s1028_s16 }
 0x7b2   :  { %v342_v41 = vpop.permute.xlu2 %341 }
 0x7b3   :  { %v344_v42 = vmul.f32 %v342_v41, %v320_v33 }
 0x7b5   :  { %346 = vrot.lane.b32.xlu0 %v344_v42, %s1027_s4 }
 0x827   :  { %v347_v43 = vpop.permute.xlu0 %346 }
 0x828   :  { %v1207_v44 = vadd.f32 %v887_v37, %v347_v43 }
 0x82a   :  { %v356_v45 = vrot.slane %v1207_v44, 4 }
 0x82c   :  { %357 = vrot.lane.b32.xlu1 %v356_v45, %s1026_s2 }
 0x89e   :  { %v358_v46 = vpop.permute.xlu1 %357 }
 0x89f   :  { %846 = vmatmul.msk.f32.vlgmr.msrb.gmra.mxu1 %vm83_vm0, %v358_v46 }
 0x91c   :  { %v378_v47 = vpop.f32.mrf.mxu1 }
 0x91d   :  { %v404_v48 = vadd.f32 %v378_v47, %v1161_v12  ;;  %v382_v50 = vrot.slane %v378_v47, 2 }
 0x91f   :  { %v406_v49 = vrot.slane %v404_v48, 2  ;;  %v384_v51 = vadd.f32 %v382_v50, %v1171_v17 }
 0x921   :  { %407 = vrot.lane.b32.xlu2 %v406_v49, %s1026_s2  ;;  %v847_v52 = vmul.f32 -1.442695, %v384_v51 }
 0x923   :  { %888 = vpow2.f32 %v847_v52 }
 0x929   :  { %v889_v53 = vpop.eup %888 }
 0x92a   :  { %v388_v54 = vadd.f32 1.0, %v889_v53 }
 0x92c   :  { %890 = vrcp.f32 %v388_v54  ;;  %v400_v60 = vand.u32 2147483648, %v388_v54  ;;  %vm394_vm15 = vweird.f32 %v388_v54  ;;  %v398_v61 = vand.u32 2147483647, %v388_v54 }
 0x92e   :  { %v401_v63 = vor.u32 1.1754944e-38, %v400_v60  ;;  %vm399_vm2 = vcmp.eq.f32.partialorder %v398_v61, 8.507059e+37 }
 0x932   :  { %v891_v55 = vpop.eup %890 }
 0x933   :  { %v390_v56 = vmul.f32 %v891_v55, %v388_v54  ;;  %vm395_vm14 = vweird.f32 %v891_v55 }
 0x934   :  { %vm396_vm1 = vmor %vm394_vm15, %vm395_vm14 }
 0x935   :  { %v391_v57 = vsub.f32 1.0, %v390_v56 }
 0x937   :  { %v392_v58 = vmul.f32 %v891_v55, %v391_v57 }
 0x939   :  { %v393_v59 = vadd.f32 %v891_v55, %v392_v58 }
 0x93b   :  { %v397_v62 = vsel %vm396_vm1, %v891_v55, %v393_v59 }
 0x93c   :  { %v402_v1 = vsel %vm399_vm2, %v401_v63, %v397_v62 }
 0x97b   :  { %v408_v0 = vpop.permute.xlu2 %407 }
 0x97c   :  { %v410_v2 = vmul.f32 %v408_v0, %v402_v1 }
 0x97e   :  { %412 = vrot.lane.b32.xlu0 %v410_v2, %s1026_s2 }
 0x9f0   :  { %v413_v3 = vpop.permute.xlu0 %412 }
 0x9f1   :  { %v415_v4 = vadd.f32 %v413_v3, %v1171_v17  ;;  %v78_v17 = vld [vmem:[#allocation3 + $0x8] sm:$0xff] }
 0x9f2   :  { %839 = vmatmul.msk.f32.gmra.mxu0 %vm83_vm0, %v78_v17 }
 0x9f3   :  { %892 = vtanh.f32 %v415_v4 }
 0x9f9   :  { %v893_v5 = vpop.eup %892 }
 0x9fa   :  { %v418_v6 = vrot.slane %v893_v5, 2 }
 0x9fc   :  { %v420_v7 = vsub.f32 %v1207_v44, %v418_v6 }
 0x9fe   :  { %v422_v8 = vrot.slane %v420_v7, 6 }
 0xa00   :  { %423 = vrot.lane.b32.xlu1 %v422_v8, %s1028_s16 }
 0xa6f   :  { %v110_v21 = vpop.f32.mrf.mxu0 }
 0xa70   :  { %v1229_v22 = vadd.f32 %v1168_v15, %v110_v21 }
 0xa72   :  { %v424_v10 = vpop.permute.xlu1 %423 }
 0xa73   :  { %v426_v11 = vmul.f32 %v424_v10, %v402_v1 }
 0xa75   :  { %428 = vrot.lane.b32.xlu2 %v426_v11, %s1027_s4 }
 0xacf   :  { %v429_v13 = vpop.permute.xlu2 %428 }
 0xad0   :  { %v1220_v14 = vadd.f32 %v893_v5, %v429_v13 }
 0xad2   :  { %v438_v16 = vrot.slane %v1220_v14, 6 }
 0xad4   :  { %439 = vrot.lane.b32.xlu0 %v438_v16, %s1026_s2 }
 0xb46   :  { %v440_v18 = vpop.permute.xlu0 %439 }
 0xb47   :  { %848 = vmatmul.msk.f32.vlgmr.msra.gmra.mxu2 %vm83_vm0, %v440_v18 }
 0xbca   :  { %v460_v19 = vpop.f32.mrf.mxu2 }
 0xbcb   :  { %v483_v20 = vadd.f32 %v460_v19, %v1161_v12  ;;  %v463_v23 = vadd.f32 %v460_v19, %v1229_v22 }
 0xbcd   :  { %485 = vrot.lane.b32.xlu1 %v483_v20, %s1026_s2  ;;  %v849_v24 = vmul.f32 -1.442695, %v463_v23 }
 0xbcf   :  { %894 = vpow2.f32 %v849_v24 }
 0xbd5   :  { %v895_v25 = vpop.eup %894 }
 0xbd6   :  { %v467_v26 = vadd.f32 1.0, %v895_v25 }
 0xbd8   :  { %896 = vrcp.f32 %v467_v26  ;;  %v479_v32 = vand.u32 2147483648, %v467_v26  ;;  %vm473_vm4 = vweird.f32 %v467_v26  ;;  %v477_v33 = vand.u32 2147483647, %v467_v26 }
 0xbda   :  { %v480_v15 = vor.u32 1.1754944e-38, %v479_v32  ;;  %vm478_vm7 = vcmp.eq.f32.partialorder %v477_v33, 8.507059e+37 }
 0xbde   :  { %v897_v27 = vpop.eup %896 }
 0xbdf   :  { %v469_v28 = vmul.f32 %v897_v27, %v467_v26  ;;  %vm474_vm3 = vweird.f32 %v897_v27 }
 0xbe0   :  { %vm475_vm6 = vmor %vm473_vm4, %vm474_vm3  ;;  %vm272_vm4 = vcmask 257026  }
 0xbe1   :  { %v470_v29 = vsub.f32 1.0, %v469_v28 }
 0xbe3   :  { %v471_v30 = vmul.f32 %v897_v27, %v470_v29 }
 0xbe5   :  { %v472_v31 = vadd.f32 %v897_v27, %v471_v30 }
 0xbe7   :  { %v476_v34 = vsel %vm475_vm6, %v897_v27, %v472_v31  ;;  %vm354_vm6 = vcmask 259076  }
 0xbe8   :  { %v481_v36 = vsel %vm478_vm7, %v480_v15, %v476_v34  ;;  %vm436_vm7 = vcmask 261126  }
 0xc3f   :  { %v486_v35 = vpop.permute.xlu1 %485 }
 0xc40   :  { %v488_v37 = vmul.f32 %v486_v35, %v481_v36 }
 0xc42   :  { %490 = vrot.lane.b32.xlu2 %v488_v37, %s1026_s2 }
 0xc9c   :  { %v491_v38 = vpop.permute.xlu2 %490 }
 0xc9d   :  { %v493_v39 = vadd.f32 %v491_v38, %v1229_v22 }
 0xc9f   :  { %898 = vtanh.f32 %v493_v39 }
 0xca5   :  { %v899_v40 = vpop.eup %898 }
 0xca6   :  { %v496_v41 = vrot.slane %v899_v40, 2 }
 0xca8   :  { %v498_v42 = vsub.f32 %v1220_v14, %v496_v41 }
 0xcaa   :  { %v500_v43 = vrot.slane %v498_v42, 6 }
 0xcac   :  { %501 = vrot.lane.b32.xlu0 %v500_v43, %s1028_s16 }
 0xd1e   :  { %v502_v45 = vpop.permute.xlu0 %501 }
 0xd1f   :  { %v504_v46 = vmul.f32 %v502_v45, %v481_v36 }
 0xd21   :  { %506 = vrot.lane.b32.xlu1 %v504_v46, %s1027_s4 }
 0xd93   :  { %v507_v47 = vpop.permute.xlu1 %506 }
 0xd94   :  { %v509_v48 = vadd.f32 %v899_v40, %v507_v47 }
 0xd96   :  { %511 = vrot.lane.b32.xlu2 %v509_v48, %s1026_s2 }
 0xdf0   :  { %v512_v49 = vpop.permute.xlu2 %511 }
 0xdf1   :  { %514 = vst.msk [vmem:[#allocation8 + $0x8] sm:$0x3] %vm193_vm5, %v512_v49  ;;  %850 = vmatmul.msk.f32.vlgmr.msra.gmra.mxu3 %vm83_vm0, %v512_v49 }
 0xe74   :  { %v534_v50 = vpop.f32.mrf.mxu3 }
 0xe75   :  { %v560_v51 = vadd.f32 %v534_v50, %v1161_v12  ;;  %v538_v53 = vrot.slane %v534_v50, 6 }
 0xe77   :  { %v562_v52 = vrot.slane %v560_v51, 6  ;;  %v540_v54 = vadd.f32 %v538_v53, %v1229_v22 }
 0xe79   :  { %563 = vrot.lane.b32.xlu0 %v562_v52, %s1026_s2  ;;  %v851_v55 = vmul.f32 -1.442695, %v540_v54 }
 0xe7b   :  { %900 = vpow2.f32 %v851_v55 }
 0xe81   :  { %v901_v56 = vpop.eup %900 }
 0xe82   :  { %v544_v57 = vadd.f32 1.0, %v901_v56 }
 0xe84   :  { %902 = vrcp.f32 %v544_v57  ;;  %v556_v63 = vand.u32 2147483648, %v544_v57  ;;  %vm550_vm8 = vweird.f32 %v544_v57  ;;  %v554_v0 = vand.u32 2147483647, %v544_v57 }
 0xe86   :  { %v557_v2 = vor.u32 1.1754944e-38, %v556_v63  ;;  %vm555_vm10 = vcmp.eq.f32.partialorder %v554_v0, 8.507059e+37 }
 0xe8a   :  { %v903_v58 = vpop.eup %902 }
 0xe8b   :  { %v546_v59 = vmul.f32 %v903_v58, %v544_v57  ;;  %vm551_vm5 = vweird.f32 %v903_v58 }
 0xe8c   :  { %vm552_vm9 = vmor %vm550_vm8, %vm551_vm5 }
 0xe8d   :  { %v547_v60 = vsub.f32 1.0, %v546_v59 }
 0xe8f   :  { %v548_v61 = vmul.f32 %v903_v58, %v547_v60 }
 0xe91   :  { %v549_v62 = vadd.f32 %v903_v58, %v548_v61 }
 0xe93   :  { %v553_v1 = vsel %vm552_vm9, %v903_v58, %v549_v62 }
 0xe94   :  { %v558_v4 = vsel %vm555_vm10, %v557_v2, %v553_v1 }
 0xeeb   :  { %v564_v3 = vpop.permute.xlu0 %563 }
 0xeec   :  { %v566_v5 = vmul.f32 %v564_v3, %v558_v4 }
 0xeee   :  { %568 = vrot.lane.b32.xlu1 %v566_v5, %s1026_s2 }
 0xf60   :  { %v569_v6 = vpop.permute.xlu1 %568 }
 0xf61   :  { %v571_v7 = vadd.f32 %v569_v6, %v1229_v22 }
 0xf63   :  { %904 = vtanh.f32 %v571_v7 }
 0xf69   :  { %v905_v8 = vpop.eup %904 }
 0xf6a   :  { %v574_v10 = vrot.slane %v905_v8, 2 }
 0xf6c   :  { %v576_v11 = vsub.f32 %v509_v48, %v574_v10 }
 0xf6e   :  { %v578_v13 = vrot.slane %v576_v11, 6 }
 0xf70   :  { %579 = vrot.lane.b32.xlu2 %v578_v13, %s1028_s16 }
 0xfca   :  { %v580_v16 = vpop.permute.xlu2 %579 }
 0xfcb   :  { %v582_v17 = vmul.f32 %v580_v16, %v558_v4 }
 0xfcd   :  { %584 = vrot.lane.b32.xlu0 %v582_v17, %s1027_s4 }
0x103f   :  { %v585_v18 = vpop.permute.xlu0 %584 }
0x1040   :  { %v1247_v19 = vadd.f32 %v905_v8, %v585_v18 }
0x1042   :  { %v593_v20 = vrot.slane %v1247_v19, 2 }
0x1044   :  { %594 = vrot.lane.b32.xlu1 %v593_v20, %s1026_s2 }
0x10b6   :  { %v595_v21 = vpop.permute.xlu1 %594 }
0x10b7   :  { %852 = vmatmul.msk.f32.vlgmr.msrb.gmra.mxu0 %vm83_vm0, %v595_v21 }
0x1134   :  { %v615_v23 = vpop.f32.mrf.mxu0 }
0x1135   :  { %v641_v24 = vadd.f32 %v615_v23, %v1161_v12  ;;  %v619_v26 = vrot.slane %v615_v23, 4 }
0x1137   :  { %v643_v25 = vrot.slane %v641_v24, 4  ;;  %v621_v27 = vadd.f32 %v619_v26, %v1229_v22  ;;  %v759_v26 = vld [vmem:[%s1314_s6 + $0x8] sm:$0xff] }
0x1139   :  { %644 = vrot.lane.b32.xlu2 %v643_v25, %s1026_s2  ;;  %v853_v28 = vmul.f32 -1.442695, %v621_v27  ;;  %v761_v25 = vld [vmem:[%s1314_s6 + $0x18] sm:$0xff] }
0x113a   :  { %784 = vmatpush.msrb.mxu2 %v761_v25 }
0x113b   :  { %906 = vpow2.f32 %v853_v28 }
0x1141   :  { %v907_v29 = vpop.eup %906 }
0x1142   :  { %v625_v30 = vadd.f32 1.0, %v907_v29 }
0x1144   :  { %908 = vrcp.f32 %v625_v30  ;;  %v637_v35 = vand.u32 2147483648, %v625_v30  ;;  %vm631_vm12 = vweird.f32 %v625_v30  ;;  %v635_v36 = vand.u32 2147483647, %v625_v30 }
0x1146   :  { %v638_v38 = vor.u32 1.1754944e-38, %v637_v35  ;;  %vm636_vm14 = vcmp.eq.f32.partialorder %v635_v36, 8.507059e+37 }
0x114a   :  { %v909_v31 = vpop.eup %908 }
0x114b   :  { %v627_v32 = vmul.f32 %v909_v31, %v625_v30  ;;  %vm632_vm11 = vweird.f32 %v909_v31 }
0x114c   :  { %vm633_vm13 = vmor %vm631_vm12, %vm632_vm11 }
0x114d   :  { %v628_v33 = vsub.f32 1.0, %v627_v32 }
0x114f   :  { %v629_v34 = vmul.f32 %v909_v31, %v628_v33  ;;  %v869_v33 = vld [vmem:[#allocation2] ss:$0 sm:$0xff] }
0x1151   :  { %v630_v15 = vadd.f32 %v909_v31, %v629_v34 }
0x1153   :  { %v634_v37 = vsel %vm633_vm13, %v909_v31, %v630_v15 }
0x1154   :  { %v639_v40 = vsel %vm636_vm14, %v638_v38, %v634_v37 }
0x1193   :  { %v645_v39 = vpop.permute.xlu2 %644 }
0x1194   :  { %v647_v41 = vmul.f32 %v645_v39, %v639_v40 }
0x1196   :  { %649 = vrot.lane.b32.xlu0 %v647_v41, %s1026_s2 }
0x1208   :  { %v650_v42 = vpop.permute.xlu0 %649 }
0x1209   :  { %v652_v43 = vadd.f32 %v650_v42, %v1229_v22 }
0x120b   :  { %910 = vtanh.f32 %v652_v43 }
0x1211   :  { %v911_v45 = vpop.eup %910 }
0x1212   :  { %v655_v46 = vrot.slane %v911_v45, 2 }
0x1214   :  { %v657_v47 = vsub.f32 %v1247_v19, %v655_v46 }
0x1216   :  { %v659_v48 = vrot.slane %v657_v47, 6 }
0x1218   :  { %660 = vrot.lane.b32.xlu1 %v659_v48, %s1028_s16 }
0x128a   :  { %v661_v49 = vpop.permute.xlu1 %660 }
0x128b   :  { %v663_v50 = vmul.f32 %v661_v49, %v639_v40 }
0x128d   :  { %665 = vrot.lane.b32.xlu2 %v663_v50, %s1027_s4 }
0x12e7   :  { %v666_v51 = vpop.permute.xlu2 %665 }
0x12e8   :  { %v668_v52 = vadd.f32 %v911_v45, %v666_v51 }
0x12ea   :  { %v674_v53 = vrot.slane %v668_v52, 4 }
0x12ec   :  { %675 = vrot.lane.b32.xlu0 %v674_v53, %s1026_s2 }
0x135e   :  { %v676_v54 = vpop.permute.xlu0 %675 }
0x135f   :  { %854 = vmatmul.msk.f32.vlgmr.msra.gmra.mxu1 %vm83_vm0, %v676_v54 }
0x13dc   :  { %v696_v55 = vpop.f32.mrf.mxu1 }
0x13dd   :  { %v722_v56 = vadd.f32 %v696_v55, %v1161_v12  ;;  %v700_v58 = vrot.slane %v696_v55, 2 }
0x13df   :  { %v724_v57 = vrot.slane %v722_v56, 2  ;;  %v702_v59 = vadd.f32 %v700_v58, %v1229_v22 }
0x13e1   :  { %725 = vrot.lane.b32.xlu1 %v724_v57, %s1026_s2  ;;  %v855_v60 = vmul.f32 -1.442695, %v702_v59 }
0x13e3   :  { %912 = vpow2.f32 %v855_v60 }
0x13e9   :  { %v913_v61 = vpop.eup %912 }
0x13ea   :  { %v706_v62 = vadd.f32 1.0, %v913_v61 }
0x13ec   :  { %914 = vrcp.f32 %v706_v62  ;;  %v718_v4 = vand.u32 2147483648, %v706_v62  ;;  %vm712_vm1 = vweird.f32 %v706_v62  ;;  %v716_v12 = vand.u32 2147483647, %v706_v62 }
0x13ee   :  { %v719_v6 = vor.u32 1.1754944e-38, %v718_v4  ;;  %vm717_vm3 = vcmp.eq.f32.partialorder %v716_v12, 8.507059e+37 }
0x13f2   :  { %v915_v63 = vpop.eup %914 }
0x13f3   :  { %v708_v0 = vmul.f32 %v915_v63, %v706_v62  ;;  %vm713_vm15 = vweird.f32 %v915_v63 }
0x13f4   :  { %vm714_vm2 = vmor %vm712_vm1, %vm713_vm15 }
0x13f5   :  { %v709_v1 = vsub.f32 1.0, %v708_v0 }
0x13f7   :  { %v710_v2 = vmul.f32 %v915_v63, %v709_v1 }
0x13f9   :  { %v711_v3 = vadd.f32 %v915_v63, %v710_v2 }
0x13fb   :  { %v715_v5 = vsel %vm714_vm2, %v915_v63, %v711_v3 }
0x13fc   :  { %v720_v8 = vsel %vm717_vm3, %v719_v6, %v715_v5 }
0x1453   :  { %v726_v7 = vpop.permute.xlu1 %725 }
0x1454   :  { %v728_v10 = vmul.f32 %v726_v7, %v720_v8 }
0x1456   :  { %730 = vrot.lane.b32.xlu2 %v728_v10, %s1026_s2 }
0x145e   :  { %269 = vrot.lane.b32.xlu2 %v1194_v9, %s1026_s2 }
0x1466   :  { %589 = vrot.lane.b32.xlu2 %v1247_v19, %s1026_s2 }
0x14b0   :  { %v731_v11 = vpop.permute.xlu2 %730 }
0x14b1   :  { %v733_v13 = vadd.f32 %v731_v11, %v1229_v22 }
0x14b3   :  { %916 = vtanh.f32 %v733_v13 }
0x14b8   :  { %v270_v16 = vpop.permute.xlu2 %269 }
0x14b9   :  { %v917_v17 = vpop.eup %916  ;;  %273 = vst.msk [vmem:[#allocation8] sm:$0xc] %vm272_vm4, %v270_v16 }
0x14ba   :  { %v736_v18 = vrot.slane %v917_v17, 2 }
0x14bc   :  { %v738_v20 = vsub.f32 %v668_v52, %v736_v18 }
0x14be   :  { %v740_v21 = vrot.slane %v738_v20, 6 }
0x14c0   :  { %741 = vrot.lane.b32.xlu0 %v740_v21, %s1028_s16  ;;  %v590_v23 = vpop.permute.xlu2 %589 }
0x14c1   :  { %592 = vst.msk [vmem:[#allocation8 + $0x8] sm:$0xc] %vm272_vm4, %v590_v23 }
0x14c8   :  { %351 = vrot.lane.b32.xlu0 %v1207_v44, %s1026_s2  ;;  %v760_v44 = vld [vmem:[%s1314_s6 + $0x10] sm:$0xff] }
0x14c9   :  { %785 = vmatpush.msrb.mxu2 %v760_v44 }
0x14cb   :  { %786 = vmatpush.msrb.mxu2 %v759_v26 }
0x14d0   :  { %670 = vrot.lane.b32.xlu0 %v668_v52, %s1026_s2 }
0x1532   :  { %v742_v9 = vpop.permute.xlu0 %741 }
0x1533   :  { %v744_v19 = vmul.f32 %v742_v9, %v720_v8 }
0x1535   :  { %746 = vrot.lane.b32.xlu1 %v744_v19, %s1027_s4 }
0x153a   :  { %v352_v22 = vpop.permute.xlu0 %351 }
0x153b   :  { %355 = vst.msk [vmem:[#allocation8] sm:$0x30] %vm354_vm6, %v352_v22 }
0x153d   :  { %433 = vrot.lane.b32.xlu1 %v1220_v14, %s1026_s2  ;;  %v758_v14 = vld [vmem:[%s1314_s6] sm:$0xff]  ;;  %s804_s6 = sshll.u32 %s1029_s0, 4  ;;  %s805_s6 = int_to_ptr.vmem [resolvable:$true] %s804_s6 }
0x153e   :  { %787 = vmatpush.msrb.mxu2 %v758_v14 }
0x1542   :  { %v671_v24 = vpop.permute.xlu0 %670 }
0x1543   :  { %673 = vst.msk [vmem:[#allocation8 + $0x8] sm:$0x30] %vm354_vm6, %v671_v24 }
0x15a7   :  { %v747_v27 = vpop.permute.xlu1 %746 }
0x15a8   :  { %v749_v28 = vadd.f32 %v917_v17, %v747_v27 }
0x15aa   :  { %751 = vrot.lane.b32.xlu1 %v749_v28, %s1026_s2 }
0x15af   :  { %v434_v29 = vpop.permute.xlu1 %433 }
0x15b0   :  { %437 = vst.msk [vmem:[#allocation8] sm:$0xc0] %vm436_vm7, %v434_v29 }
0x15b7   :  { %v756_v30 = vld [vmem:[#allocation8] sm:$0xff] }
0x15b8   :  { %856 = vmatmul.msk.f32.vlgmr.msrb.gmra.mxu2 %vm83_vm0, %v756_v30 }
0x161c   :  { %v752_v31 = vpop.permute.xlu1 %751 }
0x161d   :  { %754 = vst.msk [vmem:[#allocation8 + $0x8] sm:$0xc0] %vm436_vm7, %v752_v31 }
0x161e   :  { %755 = vst.msk [vmem:[#allocation9 - $0x6] sm:$0xc0] %vm436_vm7, %v752_v31  ;;  %812 = dma.vmem_to_hbm [thread:$0]  %s805_s6, 256, %s807_s27, [#allocation5], %s1023_s23, %s1023_s23, %s1024_s24  }
0x161f   :  { %823 = dma.vmem_to_hbm [thread:$0]  %s819_s29, 32, %s821_s12, [#allocation10]  }
0x1624   :  { %v757_v32 = vld [vmem:[#allocation8 + $0x8] sm:$0xff] }
0x1625   :  { %857 = vmatmul.msk.f32.gmra.mxu2 %vm83_vm0, %v757_v32  ;;  %vm795_vm0 = vcmask 7168  }
0x163b   :  { %v789_v34 = vpop.f32.mrf.mxu2 }
0x163c   :  { %v790_v15 = vadd.f32 %v869_v33, %v789_v34 }
0x163e   :  { %796 = vst.msk [vmem:[%s1316_s8] sm:$0xff] %vm795_vm0, %v790_v15 }
0x16a8   :  { %v792_v35 = vpop.f32.mrf.mxu2 }
0x16a9   :  { %v793_v36 = vadd.f32 %v869_v33, %v792_v35 }
0x16ab   :  { %797 = vst.msk [vmem:[%s1316_s8 + $0x8] sm:$0xff] %vm795_vm0, %v793_v36 }
0x16ac   :  { %1018 = dma.done.wait [#allocation5], 256  }
0x16ad   :  { %1019 = vsyncadd [#allocation5], 4294967040 }
0x16ae   :  { %1020 = dma.done.wait [#allocation10], 32  }
0x16af   :  { %1021 = vsyncadd [#allocation10], 4294967264 }
0x16b0   :  { %834 = vsyncpa [#allocation4], 1 }
0x16b1   :  { %835 = vsyncpa [#allocation7], 1 }
0x16b2   :  { %836 = vsyncpa [#allocation5], 1 }
0x16b3   :  { %837 = vsyncpa [#allocation10], 1 }

</bundles_post_ra>
